<compile_context>
chip_gen: v7x
topology: tpu7x:2x2x1
jax: 0.10.0
libtpu: 0.0.40
codegen_flags: <defaults>
</compile_context>

<pallas_src>
import jax
import jax.numpy as jnp
from jax.experimental import pallas as pl
from jax.experimental.pallas import tpu as pltpu

INPUT_MEAN = [0.2788, 0.2657, 0.2629]
INPUT_STD = [0.2064, 0.1944, 0.2252]

# Per-channel affine constants baked into the kernel at trace time.
_SCALE = tuple(1.0 / s for s in INPUT_STD)
_BIAS = tuple(-m / s for m, s in zip(INPUT_MEAN, INPUT_STD))

N_WAYPOINTS = 3  # module default (unused: waypoint head is not implemented in the spec)

# ~2 MiB per pipeline buffer: double-buffered input + output (4 buffers) is
# 8 MiB, safe under v5e's 16 MiB scoped-VMEM default and well under the 32 MiB
# default on v6e/v7x, while big enough to amortize per-step overhead.
_TARGET_TILE_BYTES = 2 << 20


# ----------------------------------------------------------------------------
# Kernels
# ----------------------------------------------------------------------------
def _flat_normalize_kernel(x_ref, o_ref):
    # x_ref / o_ref: (b*c, l_tile) f32 tile of the flattened (b*c, h*w) image.
    # Sublane s corresponds to plane s = batch*3 + channel, so channel = s % 3.
    p = x_ref.shape[0]
    plane = jax.lax.broadcasted_iota(jnp.int32, (p, 1), 0)
    ch = plane % 3
    scale = jnp.where(ch == 0, _SCALE[0],
                      jnp.where(ch == 1, _SCALE[1], _SCALE[2])).astype(jnp.float32)
    bias = jnp.where(ch == 0, _BIAS[0],
                     jnp.where(ch == 1, _BIAS[1], _BIAS[2])).astype(jnp.float32)
    o_ref[...] = x_ref[...] * scale + bias


def _plane_normalize_kernel(x_ref, o_ref):
    # x_ref / o_ref: (1, 1, th, w) tile of one (batch, channel) plane.
    ch = pl.program_id(1)  # scalar channel index of this tile
    scale = jnp.where(ch == 0, _SCALE[0], jnp.where(ch == 1, _SCALE[1], _SCALE[2]))
    bias = jnp.where(ch == 0, _BIAS[0], jnp.where(ch == 1, _BIAS[1], _BIAS[2]))
    o_ref[...] = x_ref[...] * scale + bias


# ----------------------------------------------------------------------------
# Tile selection
# ----------------------------------------------------------------------------
def _largest_lane_divisor(hw: int, limit: int) -> int:
    """Largest multiple-of-128 divisor of hw that is <= limit (hw % 128 == 0)."""
    best = 128
    cand = 128
    upper = min(hw, limit)
    while cand <= upper:
        if hw % cand == 0:
            best = cand
        cand += 128
    return best


def _pick_lane_tile(n_planes: int, hw: int) -> int:
    """Lane-tile (multiple of 128, divides hw) for the flattened fast path."""
    max_elems = max(128, (_TARGET_TILE_BYTES // (4 * n_planes)) // 128 * 128)
    l_tile = _largest_lane_divisor(hw, max_elems)
    # Keep >= 2 grid steps when the whole slab would fit in one tile, so
    # v7x's two TensorCores both get work.
    if l_tile == hw and hw > 128:
        l_tile = _largest_lane_divisor(hw, hw // 2)
    return l_tile


def _pick_row_tile(h: int, w: int) -> int:
    """Rows per tile for the per-plane fallback path (bounded VMEM)."""
    max_rows = max(8, (_TARGET_TILE_BYTES // (4 * w)) // 8 * 8)
    if h <= max_rows:
        return h                       # full dim: always a legal block shape
    for th in range(max_rows, 7, -8):  # prefer an exact divisor (no masked tail)
        if h % th == 0:
            return th
    return max_rows                    # pl.cdiv grid + masked tail, still bounded


# ----------------------------------------------------------------------------
# Wrapper
# ----------------------------------------------------------------------------
def cnn_planner_forward(image: jax.Array) -> jax.Array:
    """Reproduces the implemented part of CNNPlanner.forward.

    Args:
        image: (b, 3, h, w) float32 NCHW image, values in [0, 1].

    Returns:
        (b, 3, h, w) float32: per-channel normalized image.
    """
    b, c, h, w = image.shape
    assert c == 3, "CNNPlanner expects 3-channel RGB input"
    # NOTE: if the real input arrives as uint8, pass it through and do the
    # u8->f32 convert inside the kernel instead (4x less input HBM traffic).
    image = image.astype(jnp.float32)
    hw = h * w
    n_planes = b * c

    if hw % 128 == 0:
        # Fast path: lane-dense (b*c, h*w) slab, a few large blocks.
        flat = image.reshape(n_planes, hw)  # free view of a contiguous NCHW array
        l_tile = _pick_lane_tile(n_planes, hw)
        out = pl.pallas_call(
            _flat_normalize_kernel,
            out_shape=jax.ShapeDtypeStruct((n_planes, hw), jnp.float32),
            grid_spec=pltpu.PrefetchScalarGridSpec(
                num_scalar_prefetch=0,
                grid=(hw // l_tile,),
                in_specs=[pl.BlockSpec((n_planes, l_tile), lambda li: (0, li))],
                out_specs=pl.BlockSpec((n_planes, l_tile), lambda li: (0, li)),
            ),
            compiler_params=pltpu.CompilerParams(
                dimension_semantics=("parallel",),
            ),
        )(flat)
        out = out.reshape(b, c, h, w)
    else:
        # Fallback: per-(batch, channel) plane with bounded row tiles.  Lane
        # width is w (full dim -> legal block; masked stores if w % 128 != 0).
        th = _pick_row_tile(h, w)
        out = pl.pallas_call(
            _plane_normalize_kernel,
            out_shape=jax.ShapeDtypeStruct((b, c, h, w), jnp.float32),
            grid_spec=pltpu.PrefetchScalarGridSpec(
                num_scalar_prefetch=0,
                grid=(b, c, pl.cdiv(h, th)),
                in_specs=[pl.BlockSpec((1, 1, th, w),
                                       lambda bi, ci, ti: (bi, ci, ti, 0))],
                out_specs=pl.BlockSpec((1, 1, th, w),
                                       lambda bi, ci, ti: (bi, ci, ti, 0)),
            ),
            compiler_params=pltpu.CompilerParams(
                dimension_semantics=("parallel", "parallel", "parallel"),
            ),
        )(image)

    # TODO(synk): CNNPlanner.forward raises NotImplementedError after the
    # normalization (no backbone producing (b, n_waypoints, 2) is defined), so
    # only the normalized image is returned.  When a backbone kernel exists,
    # fuse this affine (compile-time scale/bias) into its first input load and
    # delete this standalone HBM round trip; emit bf16 here if the backbone
    # consumes bf16.
    return out


if __name__ == "__main__":
    def _ref(img):
        mean = jnp.asarray(INPUT_MEAN, dtype=jnp.float32)[None, :, None, None]
        std = jnp.asarray(INPUT_STD, dtype=jnp.float32)[None, :, None, None]
        return (img - mean) / std

    # Fast path: lane-dense flattened slab (h*w % 128 == 0).
    key = jax.random.PRNGKey(0)
    b, c, h, w = 2, 3, 64, 128
    image = jax.random.uniform(key, (b, c, h, w), dtype=jnp.float32)  # vals in [0, 1]
    out = jax.block_until_ready(cnn_planner_forward(image))
    assert out.shape == (b, c, h, w)
    assert jnp.allclose(out, _ref(image), atol=1e-5, rtol=1e-5)

    # Fallback path: awkward spatial size (h*w % 128 != 0, w < 128).
    image2 = jax.random.uniform(jax.random.PRNGKey(1), (1, 3, 10, 96),
                                dtype=jnp.float32)
    out2 = jax.block_until_ready(cnn_planner_forward(image2))
    assert out2.shape == (1, 3, 10, 96)
    assert jnp.allclose(out2, _ref(image2), atol=1e-5, rtol=1e-5)

    print("KERNEL_OK")
</pallas_src>

<mosaic_0001>
module attributes {stable_mosaic.version = 11 : i64} {
  func.func @_flat_normalize_kernel(%arg0: i32, %arg1: memref<6x4096xf32, #tpu.memory_space<vmem>>, %arg2: memref<6x4096xf32, #tpu.memory_space<vmem>>) attributes {dimension_semantics = [#tpu.dimension_semantics<parallel>], iteration_bounds = array<i64: 2>, scalar_prefetch = 0 : i64, scratch_operands = 0 : i64, tpu.core_type = #tpu.core_type<tc>, window_params = [{transform_indices = @transform_0, window_bounds = array<i64: 6, 4096>}, {transform_indices = @transform_1, window_bounds = array<i64: 6, 4096>}]} {
    %0 = tpu.iota {dimensions = array<i32: 0>} : vector<6x1xi32>
    %c3_i32 = arith.constant 3 : i32
    %c0_i32 = arith.constant 0 : i32
    %1 = arith.cmpi eq, %c3_i32, %c0_i32 : i32
    %c1_i32 = arith.constant 1 : i32
    %2 = arith.select %1, %c1_i32, %c3_i32 : i32
    %3 = vector.broadcast %2 : i32 to vector<6x1xi32>
    %4 = arith.remsi %0, %3 : vector<6x1xi32>
    %c0_i32_0 = arith.constant 0 : i32
    %5 = vector.broadcast %c0_i32_0 : i32 to vector<6x1xi32>
    %6 = arith.cmpi ne, %4, %5 : vector<6x1xi32>
    %c0_i32_1 = arith.constant 0 : i32
    %7 = vector.broadcast %c0_i32_1 : i32 to vector<6x1xi32>
    %8 = arith.cmpi slt, %4, %7 : vector<6x1xi32>
    %c0_i32_2 = arith.constant 0 : i32
    %9 = arith.cmpi slt, %2, %c0_i32_2 : i32
    %10 = vector.broadcast %9 : i1 to vector<6x1xi1>
    %11 = vector.broadcast %10 : vector<6x1xi1> to vector<6x1xi1>
    %12 = arith.xori %8, %11 : vector<6x1xi1>
    %13 = arith.andi %12, %6 : vector<6x1xi1>
    %14 = vector.broadcast %2 : i32 to vector<6x1xi32>
    %15 = arith.addi %4, %14 : vector<6x1xi32>
    %16 = arith.select %13, %15, %4 : vector<6x1xi1>, vector<6x1xi32>
    %c0_i32_3 = arith.constant 0 : i32
    %17 = vector.broadcast %c0_i32_3 : i32 to vector<6x1xi32>
    %18 = arith.cmpi eq, %16, %17 : vector<6x1xi32>
    %c1_i32_4 = arith.constant 1 : i32
    %19 = vector.broadcast %c1_i32_4 : i32 to vector<6x1xi32>
    %20 = arith.cmpi eq, %16, %19 : vector<6x1xi32>
    %cst = arith.constant 5.14403296 : f32
    %cst_5 = arith.constant 4.4404974 : f32
    %21 = vector.broadcast %cst : f32 to vector<6x1xf32>
    %22 = vector.broadcast %cst_5 : f32 to vector<6x1xf32>
    %23 = arith.select %20, %21, %22 : vector<6x1xi1>, vector<6x1xf32>
    %cst_6 = arith.constant 4.84496117 : f32
    %24 = vector.broadcast %cst_6 : f32 to vector<6x1xf32>
    %25 = arith.select %18, %24, %23 : vector<6x1xi1>, vector<6x1xf32>
    %c0_i32_7 = arith.constant 0 : i32
    %26 = vector.broadcast %c0_i32_7 : i32 to vector<6x1xi32>
    %27 = arith.cmpi eq, %16, %26 : vector<6x1xi32>
    %c1_i32_8 = arith.constant 1 : i32
    %28 = vector.broadcast %c1_i32_8 : i32 to vector<6x1xi32>
    %29 = arith.cmpi eq, %16, %28 : vector<6x1xi32>
    %cst_9 = arith.constant -1.36676955 : f32
    %cst_10 = arith.constant -1.1674068 : f32
    %30 = vector.broadcast %cst_9 : f32 to vector<6x1xf32>
    %31 = vector.broadcast %cst_10 : f32 to vector<6x1xf32>
    %32 = arith.select %29, %30, %31 : vector<6x1xi1>, vector<6x1xf32>
    %cst_11 = arith.constant -1.35077524 : f32
    %33 = vector.broadcast %cst_11 : f32 to vector<6x1xf32>
    %34 = arith.select %27, %33, %32 : vector<6x1xi1>, vector<6x1xf32>
    %c0 = arith.constant 0 : index
    %c0_12 = arith.constant 0 : index
    %35 = vector.load %arg1[%c0, %c0_12] : memref<6x4096xf32, #tpu.memory_space<vmem>>, vector<6x4096xf32>
    %36 = vector.broadcast %25 : vector<6x1xf32> to vector<6x4096xf32>
    %37 = arith.mulf %35, %36 : vector<6x4096xf32>
    %38 = vector.broadcast %34 : vector<6x1xf32> to vector<6x4096xf32>
    %39 = arith.addf %37, %38 : vector<6x4096xf32>
    %c0_13 = arith.constant 0 : index
    %c0_14 = arith.constant 0 : index
    %40 = vector.load %arg2[%c0_13, %c0_14] : memref<6x4096xf32, #tpu.memory_space<vmem>>, vector<6x4096xf32>
    tpu.vector_store %arg2[%c0_13, %c0_14], %39 {strides = array<i32>} : memref<6x4096xf32, #tpu.memory_space<vmem>>, vector<6x4096xf32>,
    return
  }
  func.func @transform_0(%arg0: i32) -> (i32, i32) {
    %c0_i32 = arith.constant 0 : i32
    %c0_i32_0 = arith.constant 0 : i32
    return %c0_i32, %arg0 : i32, i32
  }
  func.func @transform_1(%arg0: i32) -> (i32, i32) {
    %c0_i32 = arith.constant 0 : i32
    %c0_i32_0 = arith.constant 0 : i32
    return %c0_i32, %arg0 : i32, i32
  }
}

</mosaic_0001>

<bundles_post_ra>
// kernel: tpu_custom_call.1
= control target key start
LH: loop header
LB: loop body
LE: loop exit
PB: predicated region body
PF: predicated region fallthrough
CT: control target
= control target key end

     0   :  { %6 = vsyncpa [#allocation3], 0  ;;  %s856_s0 = inlined_call_operand.hbm [shape: f32[6,8192], index: 0, kind: input, shape index: {}]   ;;  %s857_s1 = inlined_call_operand.hbm [shape: f32[6,8192], index: 1, kind: output, shape index: {}]  }
   0x1   :  { %8 = vsyncpa [#allocation3 + $0x1], 0 }
   0x2   :  { %9 = vsyncpa [#allocation4], 0 }
   0x3   :  { %11 = vsyncpa [#allocation4 + $0x1], 0  ;;  %s550_s6 = smov 0   ;;  %s552_s7 = smov 0  }
   0x4   :  { %s554_s8 = smov 0   ;;  %s556_s9 = smov 0  }
   0x5 LB: > { %s571_s10 = sadd.s32 4294967295, %s534_s9   ;;  %s372_s11 = sadd.s32 4294967294, %s534_s9   ;;  %s534_s9 = sphi %s556_s9, %s872_s9   ;;  %s530_s8 = sphi %s554_s8, %s871_s8   ;;  %s526_s7 = sphi %s552_s7, %s870_s7   ;;  %s522_s6 = sphi %s550_s6, %s869_s6  }
   0x6   : > { %s575_s12 = sadd.s32 1, %s534_s9   ;;  %s24_s13 = sadd.s32 1, %s530_s8 }
   0x7   : > { %s21_s14 = ssub.s32 %s534_s9, %s575_s12  ;;  %p31_p0 = scmp.ne.s32.totalorder %s530_s8, %s526_s7 }
   0x8   : > { %p22_p1 = scmp.eq.s32.totalorder %s21_s14, 0  ;;  %p32_p2 = scmp.eq.s32.totalorder %s534_s9, 0 }
   0x9   : > { %p37_p3 = scmp.ne.s32.totalorder %s526_s7, %s522_s6  ;;  %p38_p4 = scmp.eq.s32.totalorder %s571_s10, 0 }
   0xa   : > { %s587_s15 = scalar_select %p22_p1, %s530_s8, %s24_s13  }
   0xb   : > { %p589_p5 = por %p32_p2, %p31_p0  ;;  %p593_p6 = por %p38_p4, %p37_p3 }
   0xc   : > { %p61_p7 = scmp.eq.s32.totalorder %s571_s10, 1  ;;  %p67_p8 = scmp.eq.s32.totalorder %s372_s11, 1 }
   0xd   : > { %p402_p10 = scmp.lt.s32.totalorder %s534_s9, 2  ;;  %s87_s20 = sand.u32 1, %s530_s8  }
   0xe   : > { %p600_p11 = por %p61_p7, %p31_p0  ;;  %p604_p12 = por %p67_p8, %p37_p3 }
   0xf   : > { %s386_s21 = sshll.u32 %s534_s9, 12  ;;  %s375_s22 = sshll.u32 %s87_s20, 8 }
  0x10   : > { %s861_s18 = scalar_select %p600_p11, 1, 0 }
  0x11   : > { %s862_s19 = scalar_select %p604_p12, 1, 0 }
  0x12   : > { %s613_s25 = scalar_lea.hbm %s856_s0, %s386_s21  ;;  %s91_s26 = scalar_lea.vmem [#allocation2], %s375_s22 }
  0x13   : > { %s99_s27 = sshll.u32 %s91_s26, 4  ;;  %p617_p13 = pnand %p402_p10, %p589_p5  ;;  %s621_s27 = int_to_ptr.vmem [resolvable:$true] %s99_s27 }
  0x14   : > { %s88_s29 = scalar_lea.sflag [#allocation3], %s87_s20  ;;  %s438_s30 = scalar_lea.hbm %s613_s25, 4096 }
  0x15   : > { %p439_p2 = scmp.ne.s32.totalorder %s613_s25, %s438_s30  ;;  %p440_p3 = pneg %p617_p13 }
  0x16   : > { %s443_s4 = scalar_lea.hbm %s856_s0, 8192  ;;  %p444_p5 = scmp.lt.u32.totalorder %s613_s25, %s856_s0 }
  0x17   : > { %p441_p4 = pnand %p440_p3, %p439_p2  ;;  %p445_p8 = scmp.lt.u32.totalorder %s443_s4, %s438_s30 }
  0x18   : > { %p447_p9 = scmp.lt.u32.totalorder %s438_s30, %s613_s25 }
  0x19   : > { %p442_p7 = pneg %p441_p4  ;;  %p446_p10 = por %p445_p8, %p444_p5 }
  0x1b   : > { %p448_p0 = por %p447_p9, %p446_p10 }
  0x1d   : > { %p449_p1 = pnand %p448_p0, %p442_p7 }
  0x1f   : > { %452 = shalt.err (!%p449_p1)
}
  0x20   : > { %s453_s13 = scalar_lea.vmem %s621_s27, 4096  ;;  %s536_s14 = smov [#allocation2]  }
  0x21   : > { %p454_p2 = scmp.ne.s32.totalorder %s621_s27, %s453_s13  ;;  %s458_s16 = sshll.u32 %s536_s14, 4  ;;  %s459_s16 = int_to_ptr.vmem [resolvable:$false] %s458_s16 }
  0x22   : > { %s460_s20 = scalar_lea.vmem %s459_s16, 8192  ;;  %p461_p11 = scmp.lt.s32.totalorder %s621_s27, %s459_s16 }
  0x23   : > { %p456_p4 = pnand %p454_p2, %p440_p3  ;;  %p462_p5 = scmp.lt.s32.totalorder %s460_s20, %s453_s13 }
  0x25   : > { %p457_p12 = pneg %p456_p4  ;;  %p463_p8 = por %p462_p5, %p461_p11 }
  0x27   : > { %p464_p9 = pnand %p463_p8, %p457_p12 }
  0x29   : > { %467 = shalt.err (!%p464_p9)
}
  0x2a   : > { %397 = dma.hbm_to_vmem [thread:$0]  (!%p617_p13), %s613_s25, 4096, %s621_s27, %s88_s29  }
  0x2b   : > { %p864_p0 = scmp.lt.s32.totalorder %s534_s9, 3  ;;  %p865_p1 = scmp.ge.s32.totalorder %s534_s9, 1 }
  0x2d   : > { %p105_p3 = pnand %p865_p1, %p864_p0 }
  0x2e   : > { %s655_s21 = sand.u32 (!%p105_p3), 1, %s526_s7  }
  0x2f   : > { %108 = sbr.rel (%p105_p3) target bundleno = 108 (0x6c), region = 24  ;;  %s379_s22 = sshll.u32 (!%p105_p3), %s655_s21, 8 }
  0x30   : > { %s111_s23 = scalar_lea.sflag (!%p105_p3), [#allocation3], %s655_s21  ;;  %s661_s24 = scalar_lea.vmem (!%p105_p3), [#allocation2], %s379_s22 }
  0x36   : > { %513 = dma.done.wait (%p593_p6), %s111_s23, 4096  }
  0x37   : > { %515 = vsyncadd (%p593_p6), %s111_s23, 4294963200  ;;  %v135_v0 = vlaneseq  ;;  %v159_v8 = vld [vmem:[%s661_s24] sm:$0x3f]  ;;  %v160_v9 = vld [vmem:[%s661_s24 + $0x8] sm:$0x3f]  ;;  %s709_s17 = scalar_lea.vmem [#allocation5], %s379_s22 }
  0x38   : > { %v161_v11 = vld [vmem:[%s661_s24 + $0x10] sm:$0x3f]  ;;  %v162_v12 = vld [vmem:[%s661_s24 + $0x18] sm:$0x3f]  ;;  %v163_v13 = vld [vmem:[%s661_s24 + $0x20] sm:$0x3f] }
  0x39   : > { %v136_v1 = vshrl.u32 %v135_v0, 7  ;;  %v164_v14 = vld [vmem:[%s661_s24 + $0x28] sm:$0x3f]  ;;  %v165_v15 = vld [vmem:[%s661_s24 + $0x30] sm:$0x3f]  ;;  %s387_s25 = sshll.u32 %s571_s10, 12 }
  0x3a   : > { %v537_v16 = vmov 4.4404974   ;;  %v538_v18 = vmov -1.1674068   ;;  %v166_v20 = vld [vmem:[%s661_s24 + $0x38] sm:$0x3f]  ;;  %s804_s28 = scalar_lea.hbm %s857_s1, %s387_s25 }
  0x3b   : > { %v667_v2 = vmul.u32.u64.low 2863311531, %v136_v1  ;;  %v668_v3 = vmul.u32.u64.high 2863311531, %v136_v1, %v667_v2  ;;  %v167_v27 = vld [vmem:[%s661_s24 + $0x40] sm:$0x3f]  ;;  %v168_v28 = vld [vmem:[%s661_s24 + $0x48] sm:$0x3f] }
  0x3c   : > { %v169_v33 = vld [vmem:[%s661_s24 + $0x50] sm:$0x3f]  ;;  %v170_v34 = vld [vmem:[%s661_s24 + $0x58] sm:$0x3f]  ;;  %v171_v35 = vld [vmem:[%s661_s24 + $0x60] sm:$0x3f] }
  0x3d   : > { %v143_v4 = vshrl.u32 %v668_v3, 1  ;;  %v172_v40 = vld [vmem:[%s661_s24 + $0x68] sm:$0x3f]  ;;  %v173_v41 = vld [vmem:[%s661_s24 + $0x70] sm:$0x3f]  ;;  %s302_s26 = sshll.u32 %s709_s17, 4  ;;  %s806_s26 = int_to_ptr.vmem [resolvable:$true] %s302_s26 }
  0x3e   : > { %v174_v42 = vld [vmem:[%s661_s24 + $0x78] sm:$0x3f]  ;;  %v175_v51 = vld [vmem:[%s661_s24 + $0x80] sm:$0x3f]  ;;  %v176_v52 = vld [vmem:[%s661_s24 + $0x88] sm:$0x3f] }
  0x3f   : > { %v144_v5 = vmul.u32 3, %v143_v4  ;;  %v177_v57 = vld [vmem:[%s661_s24 + $0x90] sm:$0x3f]  ;;  %v178_v58 = vld [vmem:[%s661_s24 + $0x98] sm:$0x3f]  ;;  %s288_s29 = scalar_lea.sflag [#allocation4], %s655_s21 }
  0x40   : > { %v179_v59 = vld [vmem:[%s661_s24 + $0xa0] sm:$0x3f]  ;;  %v180_v0 = vld [vmem:[%s661_s24 + $0xa8] sm:$0x3f]  ;;  %v182_v2 = vld [vmem:[%s661_s24 + $0xb8] sm:$0x3f] }
  0x41   : > { %v145_v6 = vsub.s32 %v136_v1, %v144_v5  ;;  %v181_v1 = vld [vmem:[%s661_s24 + $0xb0] sm:$0x3f]  ;;  %s468_s30 = scalar_lea.vmem %s806_s26, 4096  ;;  %p866_p11 = scmp.ne.s32.totalorder %s861_s18, 0 }
  0x42   : > { %p469_p6 = scmp.ne.s32.totalorder %s806_s26, %s468_s30  ;;  %s539_s2 = smov [#allocation5]  }
  0x43   : > { %vm148_vm0 = vcmp.ne.s32.totalorder %v145_v6, 0  ;;  %vm149_vm1 = vcmp.lt.s32.totalorder %v145_v6, 0  ;;  %v151_v7 = vadd.s32 3, %v145_v6  ;;  %s472_s3 = sshll.u32 %s539_s2, 4  ;;  %s473_s3 = int_to_ptr.vmem [resolvable:$false] %s472_s3 }
  0x44   : > { %vm150_vm2 = vmand %vm149_vm1, %vm148_vm0  ;;  %p470_p12 = pnand %p469_p6, %p866_p11  ;;  %s474_s4 = scalar_lea.vmem %s473_s3, 8192 }
  0x45   : > { %v152_v10 = vsel %vm150_vm2, %v151_v7, %v145_v6  ;;  %p475_p7 = scmp.lt.s32.totalorder %s806_s26, %s473_s3  ;;  %p476_p10 = scmp.lt.s32.totalorder %s474_s4, %s468_s30 }
  0x46   : > { %vm153_vm3 = vcmp.eq.s32.totalorder %v152_v10, 0  ;;  %vm154_vm4 = vcmp.eq.s32.totalorder %v152_v10, 1  ;;  %p471_p13 = pneg %p470_p12 }
  0x47   : > { %v155_v17 = vsel %vm154_vm4, 5.144033, %v537_v16  ;;  %v157_v19 = vsel %vm154_vm4, -1.3667696, %v538_v18  ;;  %v186_v18 = vld [vmem:[%s661_s24 + $0xd8] sm:$0x3f]  ;;  %p477_p2 = por %p476_p10, %p475_p7 }
  0x48   : > { %v679_v21 = vsel %vm153_vm3, 4.844961, %v155_v17  ;;  %v681_v22 = vsel %vm153_vm3, -1.3507752, %v157_v19  ;;  %v185_v17 = vld [vmem:[%s661_s24 + $0xd0] sm:$0x3f] }
  0x49   : > { %v191_v23 = vmul.f32 %v159_v8, %v679_v21  ;;  %v192_v24 = vmul.f32 %v160_v9, %v679_v21  ;;  %v193_v25 = vmul.f32 %v161_v11, %v679_v21  ;;  %v194_v26 = vmul.f32 %v162_v12, %v679_v21  ;;  %v183_v11 = vld [vmem:[%s661_s24 + $0xc0] sm:$0x3f]  ;;  %v184_v12 = vld [vmem:[%s661_s24 + $0xc8] sm:$0x3f]  ;;  %p478_p4 = pnand %p477_p2, %p471_p13 }
  0x4a   : > { %v195_v29 = vmul.f32 %v163_v13, %v679_v21  ;;  %v196_v30 = vmul.f32 %v164_v14, %v679_v21  ;;  %v197_v31 = vmul.f32 %v165_v15, %v679_v21  ;;  %v198_v32 = vmul.f32 %v166_v20, %v679_v21  ;;  %v187_v19 = vld [vmem:[%s661_s24 + $0xe0] sm:$0x3f] }
  0x4b   : > { %v223_v36 = vadd.f32 %v191_v23, %v681_v22  ;;  %v224_v37 = vadd.f32 %v192_v24, %v681_v22  ;;  %v225_v38 = vadd.f32 %v193_v25, %v681_v22  ;;  %v226_v39 = vadd.f32 %v194_v26, %v681_v22  ;;  %v188_v26 = vld [vmem:[%s661_s24 + $0xe8] sm:$0x3f] }
  0x4c   : > { %v227_v43 = vadd.f32 %v195_v29, %v681_v22  ;;  %v228_v44 = vadd.f32 %v196_v30, %v681_v22  ;;  %v229_v45 = vadd.f32 %v197_v31, %v681_v22  ;;  %v230_v46 = vadd.f32 %v198_v32, %v681_v22 }
  0x4d   : > { %255 = vst [vmem:[%s709_s17] sm:$0x3f] %v223_v36  ;;  %256 = vst [vmem:[%s709_s17 + $0x8] sm:$0x3f] %v224_v37  ;;  %v199_v47 = vmul.f32 %v167_v27, %v679_v21  ;;  %v200_v48 = vmul.f32 %v168_v28, %v679_v21  ;;  %v201_v49 = vmul.f32 %v169_v33, %v679_v21  ;;  %v189_v27 = vld [vmem:[%s661_s24 + $0xf0] sm:$0x3f] }
  0x4e   : > { %257 = vst [vmem:[%s709_s17 + $0x10] sm:$0x3f] %v225_v38  ;;  %258 = vst [vmem:[%s709_s17 + $0x18] sm:$0x3f] %v226_v39  ;;  %v202_v50 = vmul.f32 %v170_v34, %v679_v21  ;;  %v203_v53 = vmul.f32 %v171_v35, %v679_v21  ;;  %v204_v54 = vmul.f32 %v172_v40, %v679_v21  ;;  %v190_v28 = vld [vmem:[%s661_s24 + $0xf8] sm:$0x3f] }
  0x4f   : > { %259 = vst [vmem:[%s709_s17 + $0x20] sm:$0x3f] %v227_v43  ;;  %260 = vst [vmem:[%s709_s17 + $0x28] sm:$0x3f] %v228_v44  ;;  %v205_v55 = vmul.f32 %v173_v41, %v679_v21  ;;  %v206_v56 = vmul.f32 %v174_v42, %v679_v21  ;;  %v231_v60 = vadd.f32 %v199_v47, %v681_v22 }
  0x50   : > { %261 = vst [vmem:[%s709_s17 + $0x30] sm:$0x3f] %v229_v45  ;;  %262 = vst [vmem:[%s709_s17 + $0x38] sm:$0x3f] %v230_v46  ;;  %v232_v61 = vadd.f32 %v200_v48, %v681_v22  ;;  %v233_v62 = vadd.f32 %v201_v49, %v681_v22  ;;  %v234_v63 = vadd.f32 %v202_v50, %v681_v22 }
  0x51   : > { %v235_v3 = vadd.f32 %v203_v53, %v681_v22  ;;  %v236_v4 = vadd.f32 %v204_v54, %v681_v22  ;;  %v237_v5 = vadd.f32 %v205_v55, %v681_v22  ;;  %v238_v6 = vadd.f32 %v206_v56, %v681_v22  ;;  %263 = vst [vmem:[%s709_s17 + $0x40] sm:$0x3f] %v231_v60 }
  0x52   : > { %264 = vst [vmem:[%s709_s17 + $0x48] sm:$0x3f] %v232_v61  ;;  %265 = vst [vmem:[%s709_s17 + $0x50] sm:$0x3f] %v233_v62  ;;  %v207_v7 = vmul.f32 %v175_v51, %v679_v21  ;;  %v208_v8 = vmul.f32 %v176_v52, %v679_v21  ;;  %v209_v9 = vmul.f32 %v177_v57, %v679_v21 }
  0x53   : > { %266 = vst [vmem:[%s709_s17 + $0x58] sm:$0x3f] %v234_v63  ;;  %v210_v10 = vmul.f32 %v178_v58, %v679_v21  ;;  %267 = vst [vmem:[%s709_s17 + $0x60] sm:$0x3f] %v235_v3  ;;  %v211_v13 = vmul.f32 %v179_v59, %v679_v21  ;;  %v212_v14 = vmul.f32 %v180_v0, %v679_v21 }
  0x54   : > { %268 = vst [vmem:[%s709_s17 + $0x68] sm:$0x3f] %v236_v4  ;;  %269 = vst [vmem:[%s709_s17 + $0x70] sm:$0x3f] %v237_v5  ;;  %v213_v15 = vmul.f32 %v181_v1, %v679_v21  ;;  %v214_v16 = vmul.f32 %v182_v2, %v679_v21  ;;  %v239_v20 = vadd.f32 %v207_v7, %v681_v22 }
  0x55   : > { %270 = vst [vmem:[%s709_s17 + $0x78] sm:$0x3f] %v238_v6  ;;  %v240_v23 = vadd.f32 %v208_v8, %v681_v22  ;;  %v241_v24 = vadd.f32 %v209_v9, %v681_v22  ;;  %v242_v25 = vadd.f32 %v210_v10, %v681_v22  ;;  %v243_v29 = vadd.f32 %v211_v13, %v681_v22 }
  0x56   : > { %v244_v30 = vadd.f32 %v212_v14, %v681_v22  ;;  %v245_v31 = vadd.f32 %v213_v15, %v681_v22  ;;  %v246_v32 = vadd.f32 %v214_v16, %v681_v22  ;;  %271 = vst [vmem:[%s709_s17 + $0x80] sm:$0x3f] %v239_v20  ;;  %v215_v33 = vmul.f32 %v183_v11, %v679_v21 }
  0x57   : > { %272 = vst [vmem:[%s709_s17 + $0x88] sm:$0x3f] %v240_v23  ;;  %273 = vst [vmem:[%s709_s17 + $0x90] sm:$0x3f] %v241_v24  ;;  %v216_v34 = vmul.f32 %v184_v12, %v679_v21  ;;  %v217_v35 = vmul.f32 %v185_v17, %v679_v21  ;;  %v218_v36 = vmul.f32 %v186_v18, %v679_v21 }
  0x58   : > { %274 = vst [vmem:[%s709_s17 + $0x98] sm:$0x3f] %v242_v25  ;;  %275 = vst [vmem:[%s709_s17 + $0xa0] sm:$0x3f] %v243_v29  ;;  %v219_v37 = vmul.f32 %v187_v19, %v679_v21  ;;  %v220_v38 = vmul.f32 %v188_v26, %v679_v21  ;;  %v221_v39 = vmul.f32 %v189_v27, %v679_v21 }
  0x59   : > { %276 = vst [vmem:[%s709_s17 + $0xa8] sm:$0x3f] %v244_v30  ;;  %277 = vst [vmem:[%s709_s17 + $0xb0] sm:$0x3f] %v245_v31  ;;  %v222_v40 = vmul.f32 %v190_v28, %v679_v21  ;;  %v247_v41 = vadd.f32 %v215_v33, %v681_v22  ;;  %v248_v42 = vadd.f32 %v216_v34, %v681_v22 }
  0x5a   : > { %278 = vst [vmem:[%s709_s17 + $0xb8] sm:$0x3f] %v246_v32  ;;  %v249_v43 = vadd.f32 %v217_v35, %v681_v22  ;;  %v250_v44 = vadd.f32 %v218_v36, %v681_v22  ;;  %v251_v45 = vadd.f32 %v219_v37, %v681_v22  ;;  %v252_v46 = vadd.f32 %v220_v38, %v681_v22 }
  0x5b   : > { %v253_v47 = vadd.f32 %v221_v39, %v681_v22  ;;  %v254_v21 = vadd.f32 %v222_v40, %v681_v22  ;;  %279 = vst [vmem:[%s709_s17 + $0xc0] sm:$0x3f] %v247_v41  ;;  %280 = vst [vmem:[%s709_s17 + $0xc8] sm:$0x3f] %v248_v42 }
  0x5c   : > { %281 = vst [vmem:[%s709_s17 + $0xd0] sm:$0x3f] %v249_v43  ;;  %282 = vst [vmem:[%s709_s17 + $0xd8] sm:$0x3f] %v250_v44 }
  0x5d   : > { %283 = vst [vmem:[%s709_s17 + $0xe0] sm:$0x3f] %v251_v45  ;;  %284 = vst [vmem:[%s709_s17 + $0xe8] sm:$0x3f] %v252_v46 }
  0x5e   : > { %285 = vst [vmem:[%s709_s17 + $0xf0] sm:$0x3f] %v253_v47  ;;  %286 = vst [vmem:[%s709_s17 + $0xf8] sm:$0x3f] %v254_v21 }
  0x5f   : > { %481 = shalt.err (!%p478_p4)
}
  0x60   : > { %s482_s5 = scalar_lea.hbm %s804_s28, 4096  ;;  %s486_s14 = scalar_lea.hbm %s857_s1, 8192 }
  0x61   : > { %p483_p5 = scmp.ne.s32.totalorder %s804_s28, %s482_s5  ;;  %p487_p0 = scmp.lt.u32.totalorder %s804_s28, %s857_s1 }
  0x62   : > { %p488_p1 = scmp.lt.u32.totalorder %s486_s14, %s482_s5  ;;  %p490_p6 = scmp.lt.u32.totalorder %s482_s5, %s804_s28 }
  0x63   : > { %p484_p8 = pnand %p483_p5, %p866_p11 }
  0x64   : > { %p489_p3 = por %p488_p1, %p487_p0 }
  0x65   : > { %p485_p9 = pneg %p484_p8 }
  0x66   : > { %p491_p12 = por %p490_p6, %p489_p3 }
  0x68   : > { %p492_p13 = pnand %p491_p12, %p485_p9 }
  0x6a   : > { %495 = shalt.err (!%p492_p13)
}
  0x6b   : > { %392 = dma.vmem_to_hbm [thread:$0]  (%p866_p11), %s806_s26, 4096, %s804_s28, %s288_s29  }
  0x6c PF: > { %s314_s21 = sand.u32 1, %s522_s6   ;;  %p867_p7 = scmp.ne.s32.totalorder %s862_s19, 0 }
  0x6d   : > { %p868_p10 = scmp.ge.s32.totalorder %s534_s9, 2  ;;  %s315_s22 = scalar_lea.sflag [#allocation4], %s314_s21 }
  0x6f   : > { %p399_p2 = pnand %p868_p10, %p867_p7 }
  0x71   : > { %517 = dma.done.wait (!%p399_p2), %s315_s22, 4096  }
  0x72   : > { %519 = vsyncadd (!%p399_p2), %s315_s22, 4294963200  ;;  %p14_p4 = scmp.ge.s32.totalorder %s575_s12, 4   ;;  %s869_s6 = smov %s526_s7 }
  0x73   : > { %s870_s7 = smov %s530_s8  ;;  %s871_s8 = smov %s587_s15 }
  0x74   : > { %s872_s9 = smov %s575_s12  ;;  %16 = sbr.rel (!%p14_p4) target bundleno = 5 (0x5), region = 69 }
  0x7b   :  { %320 = vsyncpa [#allocation3], 1 }
  0x7c   :  { %322 = vsyncpa [#allocation3 + $0x1], 1 }
  0x7d   :  { %323 = vsyncpa [#allocation4], 1 }
  0x7e   :  { %325 = vsyncpa [#allocation4 + $0x1], 1 }

</bundles_post_ra>
